<compile_context>
chip_gen: v7x
topology: tpu7x:2x2x1
jax: 0.10.0
libtpu: 0.0.40
codegen_flags: <defaults>
</compile_context>

<pallas_src>
import functools

import jax
import jax.numpy as jnp
from jax.experimental import pallas as pl
from jax.experimental.pallas import tpu as pltpu

IN_DIM = 48 * 48   # 2304
H1 = 128
H2 = 64
OUT_DIM = 4

# Padded sizes.
H2_PAD = 128       # hidden-2 padded 64 -> 128 (pad weights/biases are zero)
OUT_PAD = 8        # logits padded 4 -> 8; small writeback, wrapper slices [:, :4]

TB_DEFAULT = 1024  # batch tile (f32 x tile = ~9 MiB/buffer; see vmem_limit_bytes)


def _round_up(n, m):
    return (n + m - 1) // m * m


def _mlp_kernel(x_ref, w1_ref, b1_ref, w2_ref, b2_ref, w3_ref, b3_ref, o_ref):
    # In-kernel bf16 cast of x (x arrives f32 straight from HBM; cast hides under DMA).
    x = x_ref[...].astype(jnp.bfloat16)
    # fc1 + relu: bf16 operands, f32 accumulation on the MXU.
    h1 = jnp.dot(x, w1_ref[...], preferred_element_type=jnp.float32)
    h1 = jnp.maximum(h1 + b1_ref[...], 0.0).astype(jnp.bfloat16)
    # fc2 + relu: hidden-2 padded to 128 lanes; pad columns are exactly zero.
    h2 = jnp.dot(h1, w2_ref[...], preferred_element_type=jnp.float32)
    h2 = jnp.maximum(h2 + b2_ref[...], 0.0).astype(jnp.bfloat16)
    # fc3: logits live in lanes 0..3 of an 8-wide slab.
    out = jnp.dot(h2, w3_ref[...], preferred_element_type=jnp.float32)
    o_ref[...] = (out + b3_ref[...]).astype(o_ref.dtype)


def _prepare_params(params):
    """Cast weights to bf16 and zero-pad to the kernel's padded shapes."""
    w1, b1, w2, b2, w3, b3 = params
    w1p = w1.astype(jnp.bfloat16)                                   # (2304, 128)
    b1p = b1.reshape(1, H1).astype(jnp.float32)                     # (1, 128)
    w2p = jnp.zeros((H1, H2_PAD), jnp.bfloat16).at[:, :H2].set(
        w2.astype(jnp.bfloat16))                                    # (128, 128)
    b2p = jnp.zeros((1, H2_PAD), jnp.float32).at[:, :H2].set(
        b2.reshape(1, H2).astype(jnp.float32))                      # (1, 128)
    w3p = jnp.zeros((H2_PAD, OUT_PAD), jnp.bfloat16).at[:H2, :OUT_DIM].set(
        w3.astype(jnp.bfloat16))                                    # (128, 8)
    b3p = jnp.zeros((1, OUT_PAD), jnp.float32).at[:, :OUT_DIM].set(
        b3.reshape(1, OUT_DIM).astype(jnp.float32))                 # (1, 8)
    return w1p, b1p, w2p, b2p, w3p, b3p


@functools.partial(jax.jit, static_argnames=("tb",))
def shape_classifier_forward(x, params, *, tb=TB_DEFAULT):
    """Mirrors ShapeClassifier.forward: x.view(-1, 2304) -> MLP -> logits [B, 4]."""
    x2d = x.reshape(-1, IN_DIM)     # native dtype (f32); NO wrapper-side cast or pad
    B = x2d.shape[0]

    # Balanced tile choice: multiple of 8 sublanes; no dead extra tile when B is
    # just above a tile boundary.  Large batches keep >= 4 grid steps so the
    # "parallel" batch axis can shard across both TensorCores on v7x.
    n_tiles = max(pl.cdiv(B, tb), 1)
    if B >= 4 * 512:
        n_tiles = max(n_tiles, 4)
    TB = _round_up(pl.cdiv(B, n_tiles), 8)
    grid = pl.cdiv(B, TB)           # partial last block is masked by Pallas

    w1p, b1p, w2p, b2p, w3p, b3p = _prepare_params(params)

    # Block-invariant (pinned) specs: Pallas does not re-DMA blocks whose index
    # doesn't change across grid steps, so weights are fetched from HBM once.
    pinned = lambda shape: pl.BlockSpec(shape, lambda i: (0, 0))

    out = pl.pallas_call(
        _mlp_kernel,
        out_shape=jax.ShapeDtypeStruct((B, OUT_PAD), jnp.float32),
        grid=(grid,),
        in_specs=[
            pl.BlockSpec((TB, IN_DIM), lambda i: (i, 0)),   # x: tiled over batch (f32)
            pinned((IN_DIM, H1)),                           # w1 (bf16, resident)
            pinned((1, H1)),                                # b1
            pinned((H1, H2_PAD)),                           # w2 (padded)
            pinned((1, H2_PAD)),                            # b2 (padded)
            pinned((H2_PAD, OUT_PAD)),                      # w3 (padded)
            pinned((1, OUT_PAD)),                           # b3 (padded)
        ],
        out_specs=pl.BlockSpec((TB, OUT_PAD), lambda i: (i, 0)),
        compiler_params=pltpu.CompilerParams(
            dimension_semantics=("parallel",),              # shard batch across TCs (v7x)
            vmem_limit_bytes=48 << 20,                      # > v5e 16 MiB default,
        ),                                                  #   < v7x 64 MiB physical
    )(x2d, w1p, b1p, w2p, b2p, w3p, b3p)

    return out[:B, :OUT_DIM]


def init_params(key):
    """Deterministic synthetic init (PyTorch Linear fan-in init, stored transposed)."""
    k1, k2, k3, k4, k5, k6 = jax.random.split(key, 6)

    def uniform_fan_in(k, shape, fan_in):
        bound = 1.0 / jnp.sqrt(fan_in)
        return jax.random.uniform(k, shape, jnp.float32, -bound, bound)

    # fc1: torch weight (128, 2304) -> stored as (2304, 128)
    w1 = uniform_fan_in(k1, (IN_DIM, H1), IN_DIM)
    b1 = uniform_fan_in(k2, (H1,), IN_DIM)
    # fc2: (64, 128) -> (128, 64)
    w2 = uniform_fan_in(k3, (H1, H2), H1)
    b2 = uniform_fan_in(k4, (H2,), H1)
    # fc3: (4, 64) -> (64, 4)
    w3 = uniform_fan_in(k5, (H2, OUT_DIM), H2)
    b3 = uniform_fan_in(k6, (OUT_DIM,), H2)
    return (w1, b1, w2, b2, w3, b3)


def reference_forward(x, params):
    """Pure-JAX f32 reference of the PyTorch forward."""
    w1, b1, w2, b2, w3, b3 = params
    x2d = x.reshape(-1, IN_DIM).astype(jnp.float32)
    h1 = jnp.maximum(x2d @ w1 + b1, 0.0)
    h2 = jnp.maximum(h1 @ w2 + b2, 0.0)
    return h2 @ w3 + b3


# TODO(synk): optional fp8 (v7x) / int8 (v5e/v6e) quantization of x/w1 for the fc1
# matmul would roughly halve x HBM traffic; gated behind an accuracy check, not done here.


if __name__ == "__main__":
    key = jax.random.PRNGKey(0)
    k_params, k_x1, k_x2 = jax.random.split(key, 3)

    params = init_params(k_params)

    # Small example: batch=2 grayscale 48x48 images (NCHW), as fc1's 48*48 implies.
    x = jax.random.normal(k_x1, (2, 1, 48, 48), dtype=jnp.float32)
    logits = jax.block_until_ready(shape_classifier_forward(x, params))
    ref = reference_forward(x, params)
    assert logits.shape == (2, OUT_DIM)
    # bf16 MXU operands (f32 accumulation) -> slightly looser tolerance vs f32 ref.
    assert jnp.allclose(logits, ref, atol=2e-2, rtol=2e-2), "mismatch vs reference (B=2)"

    # Exercise the ragged-batch (partial last block) path.
    x2 = jax.random.normal(k_x2, (10, 1, 48, 48), dtype=jnp.float32)
    logits2 = jax.block_until_ready(shape_classifier_forward(x2, params))
    ref2 = reference_forward(x2, params)
    assert logits2.shape == (10, OUT_DIM)
    assert jnp.allclose(logits2, ref2, atol=2e-2, rtol=2e-2), "mismatch vs reference (B=10)"

    print("KERNEL_OK")
</pallas_src>

<mosaic_0001>
module attributes {stable_mosaic.version = 11 : i64} {
  func.func @_mlp_kernel(%arg0: i32, %arg1: memref<8x2304xf32, #tpu.memory_space<vmem>>, %arg2: memref<2304x128xbf16, #tpu.memory_space<vmem>>, %arg3: memref<1x128xf32, #tpu.memory_space<vmem>>, %arg4: memref<128x128xbf16, #tpu.memory_space<vmem>>, %arg5: memref<1x128xf32, #tpu.memory_space<vmem>>, %arg6: memref<128x8xbf16, #tpu.memory_space<vmem>>, %arg7: memref<1x8xf32, #tpu.memory_space<vmem>>, %arg8: memref<8x8xf32, #tpu.memory_space<vmem>>) attributes {dimension_semantics = [#tpu.dimension_semantics<parallel>], iteration_bounds = array<i64: 1>, scalar_prefetch = 0 : i64, scratch_operands = 0 : i64, tpu.core_type = #tpu.core_type<tc>, window_params = [{transform_indices = @transform_0, window_bounds = array<i64: 8, 2304>}, {pipeline_mode = #tpu.pipeline_mode<synchronous>, transform_indices = @transform_1, window_bounds = array<i64: 2304, 128>}, {pipeline_mode = #tpu.pipeline_mode<synchronous>, transform_indices = @transform_2, window_bounds = array<i64: 1, 128>}, {pipeline_mode = #tpu.pipeline_mode<synchronous>, transform_indices = @transform_3, window_bounds = array<i64: 128, 128>}, {pipeline_mode = #tpu.pipeline_mode<synchronous>, transform_indices = @transform_4, window_bounds = array<i64: 1, 128>}, {pipeline_mode = #tpu.pipeline_mode<synchronous>, transform_indices = @transform_5, window_bounds = array<i64: 128, 8>}, {pipeline_mode = #tpu.pipeline_mode<synchronous>, transform_indices = @transform_6, window_bounds = array<i64: 1, 8>}, {transform_indices = @transform_7, window_bounds = array<i64: 8, 8>}]} {
    %c0 = arith.constant 0 : index
    %c0_0 = arith.constant 0 : index
    %0 = vector.load %arg1[%c0, %c0_0] : memref<8x2304xf32, #tpu.memory_space<vmem>>, vector<8x2304xf32>
    %1 = arith.truncf %0 : vector<8x2304xf32> to vector<8x2304xbf16>
    %c0_1 = arith.constant 0 : index
    %c0_2 = arith.constant 0 : index
    %2 = vector.load %arg2[%c0_1, %c0_2] : memref<2304x128xbf16, #tpu.memory_space<vmem>>, vector<2304x128xbf16>
    %cst = arith.constant dense<0.000000e+00> : vector<8x128xf32>
    %3 = tpu.matmul %1, %2, %cst {dimension_numbers = #tpu.dot_dimension_numbers<[1], [0], [0], [1], [0, 0, 1, 1], [], []>} : vector<8x2304xbf16>, vector<2304x128xbf16>, vector<8x128xf32> -> vector<8x128xf32>
    %c0_3 = arith.constant 0 : index
    %c0_4 = arith.constant 0 : index
    %4 = vector.load %arg3[%c0_3, %c0_4] : memref<1x128xf32, #tpu.memory_space<vmem>>, vector<1x128xf32>
    %5 = vector.broadcast %4 : vector<1x128xf32> to vector<8x128xf32>
    %6 = arith.addf %3, %5 : vector<8x128xf32>
    %cst_5 = arith.constant 0.000000e+00 : f32
    %7 = vector.broadcast %cst_5 : f32 to vector<8x128xf32>
    %8 = arith.maximumf %6, %7 : vector<8x128xf32>
    %9 = arith.truncf %8 : vector<8x128xf32> to vector<8x128xbf16>
    %c0_6 = arith.constant 0 : index
    %c0_7 = arith.constant 0 : index
    %10 = vector.load %arg4[%c0_6, %c0_7] : memref<128x128xbf16, #tpu.memory_space<vmem>>, vector<128x128xbf16>
    %cst_8 = arith.constant dense<0.000000e+00> : vector<8x128xf32>
    %11 = tpu.matmul %9, %10, %cst_8 {dimension_numbers = #tpu.dot_dimension_numbers<[1], [0], [0], [1], [0, 0, 1, 1], [], []>} : vector<8x128xbf16>, vector<128x128xbf16>, vector<8x128xf32> -> vector<8x128xf32>
    %c0_9 = arith.constant 0 : index
    %c0_10 = arith.constant 0 : index
    %12 = vector.load %arg5[%c0_9, %c0_10] : memref<1x128xf32, #tpu.memory_space<vmem>>, vector<1x128xf32>
    %13 = vector.broadcast %12 : vector<1x128xf32> to vector<8x128xf32>
    %14 = arith.addf %11, %13 : vector<8x128xf32>
    %cst_11 = arith.constant 0.000000e+00 : f32
    %15 = vector.broadcast %cst_11 : f32 to vector<8x128xf32>
    %16 = arith.maximumf %14, %15 : vector<8x128xf32>
    %17 = arith.truncf %16 : vector<8x128xf32> to vector<8x128xbf16>
    %c0_12 = arith.constant 0 : index
    %c0_13 = arith.constant 0 : index
    %18 = vector.load %arg6[%c0_12, %c0_13] : memref<128x8xbf16, #tpu.memory_space<vmem>>, vector<128x8xbf16>
    %cst_14 = arith.constant dense<0.000000e+00> : vector<8x8xf32>
    %19 = tpu.matmul %17, %18, %cst_14 {dimension_numbers = #tpu.dot_dimension_numbers<[1], [0], [0], [1], [0, 0, 1, 1], [], []>} : vector<8x128xbf16>, vector<128x8xbf16>, vector<8x8xf32> -> vector<8x8xf32>
    %c0_15 = arith.constant 0 : index
    %c0_16 = arith.constant 0 : index
    %20 = vector.load %arg7[%c0_15, %c0_16] : memref<1x8xf32, #tpu.memory_space<vmem>>, vector<1x8xf32>
    %21 = vector.broadcast %20 : vector<1x8xf32> to vector<8x8xf32>
    %22 = arith.addf %19, %21 : vector<8x8xf32>
    %c0_17 = arith.constant 0 : index
    %c0_18 = arith.constant 0 : index
    %23 = vector.load %arg8[%c0_17, %c0_18] : memref<8x8xf32, #tpu.memory_space<vmem>>, vector<8x8xf32>
    tpu.vector_store %arg8[%c0_17, %c0_18], %22 {strides = array<i32>} : memref<8x8xf32, #tpu.memory_space<vmem>>, vector<8x8xf32>,
    return
  }
  func.func @transform_0(%arg0: i32) -> (i32, i32) {
    %c0_i32 = arith.constant 0 : i32
    %c0_i32_0 = arith.constant 0 : i32
    return %arg0, %c0_i32 : i32, i32
  }
  func.func @transform_1(%arg0: i32) -> (i32, i32) {
    %c0_i32 = arith.constant 0 : i32
    %c0_i32_0 = arith.constant 0 : i32
    %c0_i32_1 = arith.constant 0 : i32
    return %c0_i32, %c0_i32_0 : i32, i32
  }
  func.func @transform_2(%arg0: i32) -> (i32, i32) {
    %c0_i32 = arith.constant 0 : i32
    %c0_i32_0 = arith.constant 0 : i32
    %c0_i32_1 = arith.constant 0 : i32
    return %c0_i32, %c0_i32_0 : i32, i32
  }
  func.func @transform_3(%arg0: i32) -> (i32, i32) {
    %c0_i32 = arith.constant 0 : i32
    %c0_i32_0 = arith.constant 0 : i32
    %c0_i32_1 = arith.constant 0 : i32
    return %c0_i32, %c0_i32_0 : i32, i32
  }
  func.func @transform_4(%arg0: i32) -> (i32, i32) {
    %c0_i32 = arith.constant 0 : i32
    %c0_i32_0 = arith.constant 0 : i32
    %c0_i32_1 = arith.constant 0 : i32
    return %c0_i32, %c0_i32_0 : i32, i32
  }
  func.func @transform_5(%arg0: i32) -> (i32, i32) {
    %c0_i32 = arith.constant 0 : i32
    %c0_i32_0 = arith.constant 0 : i32
    %c0_i32_1 = arith.constant 0 : i32
    return %c0_i32, %c0_i32_0 : i32, i32
  }
  func.func @transform_6(%arg0: i32) -> (i32, i32) {
    %c0_i32 = arith.constant 0 : i32
    %c0_i32_0 = arith.constant 0 : i32
    %c0_i32_1 = arith.constant 0 : i32
    return %c0_i32, %c0_i32_0 : i32, i32
  }
  func.func @transform_7(%arg0: i32) -> (i32, i32) {
    %c0_i32 = arith.constant 0 : i32
    %c0_i32_0 = arith.constant 0 : i32
    return %arg0, %c0_i32 : i32, i32
  }
}

</mosaic_0001>

<bundles_post_ra>
// kernel: shape_classifier_forward.1
= control target key start
LH: loop header
LB: loop body
LE: loop exit
PB: predicated region body
PF: predicated region fallthrough
CT: control target
= control target key end

     0   :  { %12 = vsyncpa [#allocation3], 0  ;;  %v75_v28 = vlaneseq  ;;  %v2664_v33 = vmov 1983009808   ;;  %vm2666_vm0 = vmmov 0   ;;  %vm2011_vm1 = vcmask 64512   ;;  %s3303_s0 = inlined_call_operand.vmem [shape: f32[2,2304], index: 0, kind: input, shape index: {}]   ;;  %s3304_s1 = inlined_call_operand.vmem [shape: bf16[2304,128], index: 1, kind: input, shape index: {}]   ;;  %s3305_s2 = inlined_call_operand.vmem [shape: f32[1,128], index: 2, kind: input, shape index: {}]   ;;  %s3306_s3 = inlined_call_operand.vmem [shape: bf16[128,128], index: 3, kind: input, shape index: {}]   ;;  %s3307_s4 = inlined_call_operand.vmem [shape: f32[1,128], index: 4, kind: input, shape index: {}]   ;;  %s3308_s5 = inlined_call_operand.vmem [shape: bf16[128,8], index: 5, kind: input, shape index: {}]   ;;  %s3309_s6 = inlined_call_operand.vmem [shape: f32[1,8], index: 6, kind: input, shape index: {}]   ;;  %s3310_s7 = inlined_call_operand.hbm [shape: f32[2,8], index: 7, kind: output, shape index: {}]  }
   0x1   :  { %v2454_v0 = vld [vmem:[%s3304_s1 + $0x40] sm:$0xff]   ;;  %v2458_v4 = vld [vmem:[%s3304_s1 + $0x48] sm:$0xff]   ;;  %v2462_v8 = vld [vmem:[%s3304_s1 + $0x50] sm:$0xff]   ;;  %v73_v34 = vunpack.c.l.s4 %v2664_v33 }
   0x2   :  { %v2455_v1 = vld [vmem:[%s3304_s1] sm:$0xff]   ;;  %2192 = vmatprep.subr.bf16.mxu0 %v2454_v0  ;;  %v2459_v5 = vld [vmem:[%s3304_s1 + $0x8] sm:$0xff]   ;;  %v2463_v9 = vld [vmem:[%s3304_s1 + $0x10] sm:$0xff]   ;;  %v76_v35 = vshrl.u32 %v75_v28, 7 }
   0x3   :  { %v2456_v2 = vld [vmem:[%s3304_s1 + $0xc0] sm:$0xff]   ;;  %2193 = vmatpush3.bf16.msra.mxu0 %v2455_v1  ;;  %v2460_v6 = vld [vmem:[%s3304_s1 + $0xc8] sm:$0xff]   ;;  %v2464_v10 = vld [vmem:[%s3304_s1 + $0xd0] sm:$0xff]   ;;  %v74_v37 = vunpack.c.0.s8 %v73_v34 }
   0x4   :  { %v2457_v3 = vld [vmem:[%s3304_s1 + $0x80] sm:$0xff]   ;;  %2214 = vmatprep.subr.bf16.mxu1 %v2456_v2  ;;  %2194 = vmatprep.subr.bf16.mxu0 %v2458_v4  ;;  %v2461_v7 = vld [vmem:[%s3304_s1 + $0x88] sm:$0xff]   ;;  %v2465_v11 = vld [vmem:[%s3304_s1 + $0x90] sm:$0xff]  }
   0x5   :  { %2215 = vmatpush3.bf16.msra.mxu1 %v2457_v3  ;;  %v2466_v12 = vld [vmem:[%s3304_s1 + $0x58] sm:$0xff]   ;;  %v2470_v16 = vld [vmem:[%s3304_s1 + $0x60] sm:$0xff]   ;;  %v2474_v20 = vld [vmem:[%s3304_s1 + $0x68] sm:$0xff]   ;;  %v2821_v42 = vsub.s32 %v74_v37, %v76_v35 }
   0x6   :  { %2216 = vmatprep.subr.bf16.mxu1 %v2460_v6  ;;  %v2467_v13 = vld [vmem:[%s3304_s1 + $0x18] sm:$0xff]   ;;  %v2471_v17 = vld [vmem:[%s3304_s1 + $0x20] sm:$0xff]   ;;  %v2475_v21 = vld [vmem:[%s3304_s1 + $0x28] sm:$0xff]  }
   0x7   :  { %2195 = vmatpush3.bf16.msra.mxu0 %v2459_v5  ;;  %v2468_v14 = vld [vmem:[%s3304_s1 + $0xd8] sm:$0xff]   ;;  %v2472_v18 = vld [vmem:[%s3304_s1 + $0xe0] sm:$0xff]   ;;  %v2476_v22 = vld [vmem:[%s3304_s1 + $0xe8] sm:$0xff]  }
   0x8   :  { %2196 = vmatprep.subr.bf16.mxu0 %v2462_v8  ;;  %v2469_v15 = vld [vmem:[%s3304_s1 + $0x98] sm:$0xff]   ;;  %v2473_v19 = vld [vmem:[%s3304_s1 + $0xa0] sm:$0xff]   ;;  %v2477_v23 = vld [vmem:[%s3304_s1 + $0xa8] sm:$0xff]  }
   0x9   :  { %2217 = vmatpush3.bf16.msra.mxu1 %v2461_v7  ;;  %v2478_v24 = vld [vmem:[%s3304_s1 + $0x70] sm:$0xff]   ;;  %v2482_v29 = vld [vmem:[%s3304_s1 + $0x78] sm:$0xff]   ;;  %v2485_v32 = vld [vmem:[%s3303_s0] ss:$36 sps:$4 sm:$0xff]  }
   0xa   :  { %2218 = vmatprep.subr.bf16.mxu1 %v2464_v10  ;;  %v2479_v25 = vld [vmem:[%s3304_s1 + $0x30] sm:$0xff]   ;;  %v2483_v30 = vld [vmem:[%s3304_s1 + $0x38] sm:$0xff]   ;;  %v2487_v36 = vld [vmem:[%s3303_s0 + $0x48] ss:$36 sps:$4 sm:$0xff]   ;;  %v78_v44 = vrot.slane %v2485_v32, %v2821_v42 }
   0xb   :  { %2197 = vmatpush3.bf16.msra.mxu0 %v2463_v9  ;;  %v2480_v26 = vld [vmem:[%s3304_s1 + $0xf0] sm:$0xff]   ;;  %v2484_v31 = vld [vmem:[%s3304_s1 + $0xf8] sm:$0xff]   ;;  %v2490_v39 = vld [vmem:[%s3304_s1 + $0x140] sm:$0xff]   ;;  %v92_v45 = vrot.slane %v2487_v36, %v2821_v42 }
   0xc   :  { %2198 = vmatprep.subr.bf16.mxu0 %v2466_v12  ;;  %v2481_v27 = vld [vmem:[%s3304_s1 + $0xb0] sm:$0xff]   ;;  %v2489_v38 = vld [vmem:[%s3304_s1 + $0xb8] sm:$0xff]   ;;  %v2491_v40 = vld [vmem:[%s3303_s0 + $0x4] ss:$36 sps:$4 sm:$0xff]  }
   0xd   :  { %2219 = vmatpush3.bf16.msra.mxu1 %v2465_v11  ;;  %v2492_v41 = vld [vmem:[%s3303_s0 + $0x4c] ss:$36 sps:$4 sm:$0xff]   ;;  %v2494_v43 = vld [vmem:[%s3304_s1 + $0x1c0] sm:$0xff]   ;;  %v85_v46 = vrot.slane %v2491_v40, %v2821_v42  ;;  %v101_v48 = vcombine.high %v78_v44, %v92_v45  ;;  %v100_v49 = vcombine.low %v78_v44, %v92_v45  ;;  %v2504_v2 = vld [vmem:[%s3304_s1 + $0x158] sm:$0xff]  }
   0xe   :  { %2220 = vmatprep.subr.bf16.mxu1 %v2468_v14  ;;  %v99_v47 = vrot.slane %v2492_v41, %v2821_v42  ;;  %v2493_v51 = vld [vmem:[%s3304_s1 + $0x100] sm:$0xff]   ;;  %v2496_v58 = vld [vmem:[%s3304_s1 + $0x148] sm:$0xff]   ;;  %v2500_v62 = vld [vmem:[%s3304_s1 + $0x150] sm:$0xff]  }
   0xf   :  { %2199 = vmatpush3.bf16.msra.mxu0 %v2467_v13  ;;  %v2495_v53 = vld [vmem:[%s3304_s1 + $0x180] sm:$0xff]   ;;  %v249_v54 = vpack.c.bf16 %v101_v48, %v101_v48  ;;  %v248_v55 = vpack.c.bf16 %v100_v49, %v100_v49  ;;  %v2498_v59 = vld [vmem:[%s3304_s1 + $0x1c8] sm:$0xff]   ;;  %v2502_v63 = vld [vmem:[%s3304_s1 + $0x1d0] sm:$0xff]  }
  0x10   :  { %2200 = vmatprep.subr.bf16.mxu0 %v2470_v16  ;;  %v103_v50 = vcombine.high %v85_v46, %v99_v47  ;;  %v102_v52 = vcombine.low %v85_v46, %v99_v47  ;;  %v2497_v60 = vld [vmem:[%s3304_s1 + $0x108] sm:$0xff]   ;;  %v2501_v0 = vld [vmem:[%s3304_s1 + $0x110] sm:$0xff]   ;;  %v2506_v3 = vld [vmem:[%s3304_s1 + $0x1d8] sm:$0xff]  }
  0x11   :  { %2221 = vmatpush3.bf16.msra.mxu1 %v2469_v15  ;;  %1457 = vmatprep.mubr.bf16.mxu0 %v249_v54  ;;  %v2499_v61 = vld [vmem:[%s3304_s1 + $0x188] sm:$0xff]   ;;  %v2503_v1 = vld [vmem:[%s3304_s1 + $0x190] sm:$0xff]   ;;  %v2505_v4 = vld [vmem:[%s3304_s1 + $0x118] sm:$0xff]  }
  0x12   :  { %2222 = vmatprep.subr.bf16.mxu1 %v2472_v18  ;;  %v251_v56 = vpack.c.bf16 %v103_v50, %v103_v50  ;;  %v250_v57 = vpack.c.bf16 %v102_v52, %v102_v52  ;;  %v2507_v5 = vld [vmem:[%s3304_s1 + $0x198] sm:$0xff]   ;;  %v2508_v6 = vld [vmem:[%s3304_s1 + $0x160] sm:$0xff]   ;;  %v2512_v10 = vld [vmem:[%s3304_s1 + $0x168] sm:$0xff]  }
  0x13   :  { %2201 = vmatpush3.bf16.msra.mxu0 %v2471_v17  ;;  %v2510_v7 = vld [vmem:[%s3304_s1 + $0x1e0] sm:$0xff]   ;;  %v2514_v11 = vld [vmem:[%s3304_s1 + $0x1e8] sm:$0xff]   ;;  %v2516_v14 = vld [vmem:[%s3304_s1 + $0x170] sm:$0xff]  }
  0x14   :  { %2202 = vmatprep.subr.bf16.mxu0 %v2474_v20  ;;  %1497 = vmatprep.mubr.bf16.mxu1 %v251_v56  ;;  %v2509_v8 = vld [vmem:[%s3304_s1 + $0x120] sm:$0xff]   ;;  %v2513_v12 = vld [vmem:[%s3304_s1 + $0x128] sm:$0xff]   ;;  %v2518_v15 = vld [vmem:[%s3304_s1 + $0x1f0] sm:$0xff]  }
  0x15   :  { %2223 = vmatpush3.bf16.msra.mxu1 %v2473_v19  ;;  %v2511_v9 = vld [vmem:[%s3304_s1 + $0x1a0] sm:$0xff]   ;;  %v2515_v13 = vld [vmem:[%s3304_s1 + $0x1a8] sm:$0xff]   ;;  %v2517_v16 = vld [vmem:[%s3304_s1 + $0x130] sm:$0xff]  }
  0x16   :  { %2224 = vmatprep.subr.bf16.mxu1 %v2476_v22  ;;  %v2519_v17 = vld [vmem:[%s3304_s1 + $0x1b0] sm:$0xff]   ;;  %v2520_v18 = vld [vmem:[%s3304_s1 + $0x178] sm:$0xff]   ;;  %v2523_v20 = vld [vmem:[%s3303_s0 + $0x8] ss:$36 sps:$4 sm:$0xff]  }
  0x17   :  { %2203 = vmatpush3.bf16.msra.mxu0 %v2475_v21  ;;  %v2522_v19 = vld [vmem:[%s3304_s1 + $0x1f8] sm:$0xff]   ;;  %v2525_v21 = vld [vmem:[%s3303_s0 + $0x50] ss:$36 sps:$4 sm:$0xff]   ;;  %v2532_v33 = vld [vmem:[%s3304_s1 + $0x2c0] sm:$0xff]  }
  0x18   :  { %2204 = vmatprep.subr.bf16.mxu0 %v2478_v24  ;;  %v2521_v22 = vld [vmem:[%s3304_s1 + $0x138] sm:$0xff]   ;;  %v128_v24 = vrot.slane %v2525_v21, %v2821_v42  ;;  %v2531_v36 = vld [vmem:[%s3304_s1 + $0x200] sm:$0xff]   ;;  %v2534_v40 = vld [vmem:[%s3304_s1 + $0x248] sm:$0xff]  }
  0x19   :  { %2225 = vmatpush3.bf16.msra.mxu1 %v2477_v23  ;;  %v114_v23 = vrot.slane %v2523_v20, %v2821_v42  ;;  %v2535_v44 = vld [vmem:[%s3304_s1 + $0x208] sm:$0xff]   ;;  %v2538_v47 = vld [vmem:[%s3304_s1 + $0x250] sm:$0xff]   ;;  %v2543_v52 = vld [vmem:[%s3304_s1 + $0x218] sm:$0xff]  }
  0x1a   :  { %2226 = vmatprep.subr.bf16.mxu1 %v2480_v26  ;;  %v2529_v26 = vld [vmem:[%s3303_s0 + $0xc] ss:$36 sps:$4 sm:$0xff]   ;;  %v2545_v54 = vld [vmem:[%s3304_s1 + $0x298] sm:$0xff]   ;;  %v2547_v56 = vld [vmem:[%s3304_s1 + $0x220] sm:$0xff]  }
  0x1b   :  { %2205 = vmatpush3.bf16.msra.mxu0 %v2479_v25  ;;  %v2527_v25 = vld [vmem:[%s3304_s1 + $0x1b8] sm:$0xff]   ;;  %v137_v28 = vcombine.high %v114_v23, %v128_v24  ;;  %v2536_v45 = vld [vmem:[%s3304_s1 + $0x2c8] sm:$0xff]   ;;  %v2539_v48 = vld [vmem:[%s3304_s1 + $0x210] sm:$0xff]  }
  0x1c   :  { %2206 = vmatprep.subr.bf16.mxu0 %v2482_v29  ;;  %v136_v29 = vcombine.low %v114_v23, %v128_v24  ;;  %v2537_v46 = vld [vmem:[%s3304_s1 + $0x288] sm:$0xff]   ;;  %v2540_v49 = vld [vmem:[%s3304_s1 + $0x2d0] sm:$0xff]   ;;  %v2569_v21 = vld [vmem:[%s3304_s1 + $0x300] sm:$0xff]  }
  0x1d   :  { %2227 = vmatpush3.bf16.msra.mxu1 %v2481_v27  ;;  %v2530_v27 = vld [vmem:[%s3303_s0 + $0x54] ss:$36 sps:$4 sm:$0xff]   ;;  %v253_v34 = vpack.c.bf16 %v137_v28, %v137_v28  ;;  %v2572_v24 = vld [vmem:[%s3304_s1 + $0x348] sm:$0xff]  }
  0x1e   :  { %2228 = vmatprep.subr.bf16.mxu1 %v2484_v31  ;;  %v121_v31 = vrot.slane %v2529_v26, %v2821_v42  ;;  %v135_v32 = vrot.slane %v2530_v27, %v2821_v42  ;;  %v252_v35 = vpack.c.bf16 %v136_v29, %v136_v29  ;;  %v2541_v50 = vld [vmem:[%s3304_s1 + $0x290] sm:$0xff]   ;;  %v2573_v28 = vld [vmem:[%s3304_s1 + $0x308] sm:$0xff]  }
  0x1f   :  { %2207 = vmatpush3.bf16.msra.mxu0 %v2483_v30  ;;  %v2528_v30 = vld [vmem:[%s3304_s1 + $0x240] sm:$0xff]   ;;  %v2574_v29 = vld [vmem:[%s3304_s1 + $0x3c8] sm:$0xff]  }
  0x20   :  { %2236 = vmatprep.subr.bf16.mxu0 %v2490_v39  ;;  %v139_v37 = vcombine.high %v121_v31, %v135_v32  ;;  %v2533_v39 = vld [vmem:[%s3304_s1 + $0x280] sm:$0xff]  }
  0x21   :  { %2229 = vmatpush3.bf16.msra.mxu1 %v2489_v38  ;;  %v138_v38 = vcombine.low %v121_v31, %v135_v32  ;;  %v2575_v31 = vld [vmem:[%s3304_s1 + $0x388] sm:$0xff]   ;;  %v2577_v32 = vld [vmem:[%s3304_s1 + $0x310] sm:$0xff]  }
  0x22   :  { %2258 = vmatprep.subr.bf16.mxu1 %v2494_v43  ;;  %1458 = vmatmul.mubr.bf16.vlgmr.msra.gmra.mrb[0].mxu0 %v248_v55  ;;  %v255_v41 = vpack.c.bf16 %v139_v37, %v139_v37  ;;  %v2546_v55 = vld [vmem:[%s3304_s1 + $0x260] sm:$0xff]   ;;  %v2582_v37 = vld [vmem:[%s3304_s1 + $0x3d8] sm:$0xff]  }
  0x23   :  { %2237 = vmatpush3.bf16.msra.mxu0 %v2493_v51  ;;  %1537 = vmatprep.mubr.bf16.mxu0 %v253_v34  ;;  %v254_v43 = vpack.c.bf16 %v138_v38, %v138_v38  ;;  %v2542_v51 = vld [vmem:[%s3304_s1 + $0x258] sm:$0xff]   ;;  %v2584_v38 = vld [vmem:[%s3304_s1 + $0x360] sm:$0xff]  }
  0x24   :  { %1498 = vmatmul.mubr.bf16.vlgmr.msra.gmra.mrb[0].mxu1 %v250_v57  ;;  %2238 = vmatprep.subr.bf16.mxu0 %v2496_v58  ;;  %v2548_v57 = vld [vmem:[%s3304_s1 + $0x2e0] sm:$0xff]   ;;  %v2580_v34 = vld [vmem:[%s3304_s1 + $0x358] sm:$0xff]  }
  0x25   :  { %2259 = vmatpush3.bf16.msra.mxu1 %v2495_v53  ;;  %1577 = vmatprep.mubr.bf16.mxu1 %v255_v41  ;;  %v2544_v53 = vld [vmem:[%s3304_s1 + $0x2d8] sm:$0xff]   ;;  %v2549_v58 = vld [vmem:[%s3304_s1 + $0x2a0] sm:$0xff]  }
  0x26   :  { %2260 = vmatprep.subr.bf16.mxu1 %v2498_v59  ;;  %v2550_v59 = vld [vmem:[%s3304_s1 + $0x268] sm:$0xff]   ;;  %v2586_v41 = vld [vmem:[%s3304_s1 + $0x3e0] sm:$0xff]  }
  0x27   :  { %2239 = vmatpush3.bf16.msra.mxu0 %v2497_v60  ;;  %v2551_v60 = vld [vmem:[%s3304_s1 + $0x228] sm:$0xff]  }
  0x28   :  { %2240 = vmatprep.subr.bf16.mxu0 %v2500_v62  ;;  %v2553_v62 = vld [vmem:[%s3304_s1 + $0x2a8] sm:$0xff]  }
  0x29   :  { %2261 = vmatpush3.bf16.msra.mxu1 %v2499_v61  ;;  %v2552_v61 = vld [vmem:[%s3304_s1 + $0x2e8] sm:$0xff]  }
  0x2a   :  { %2262 = vmatprep.subr.bf16.mxu1 %v2502_v63  ;;  %v2554_v63 = vld [vmem:[%s3304_s1 + $0x270] sm:$0xff]  }
  0x2b   :  { %2241 = vmatpush3.bf16.msra.mxu0 %v2501_v0  ;;  %v2555_v0 = vld [vmem:[%s3304_s1 + $0x230] sm:$0xff]  }
  0x2c   :  { %2242 = vmatprep.subr.bf16.mxu0 %v2504_v2  ;;  %v2557_v2 = vld [vmem:[%s3304_s1 + $0x2b0] sm:$0xff]  }
  0x2d   :  { %2263 = vmatpush3.bf16.msra.mxu1 %v2503_v1  ;;  %v2556_v1 = vld [vmem:[%s3304_s1 + $0x2f0] sm:$0xff]  }
  0x2e   :  { %2264 = vmatprep.subr.bf16.mxu1 %v2506_v3  ;;  %v2558_v3 = vld [vmem:[%s3304_s1 + $0x278] sm:$0xff]  }
  0x2f   :  { %2243 = vmatpush3.bf16.msra.mxu0 %v2505_v4  ;;  %v2559_v4 = vld [vmem:[%s3304_s1 + $0x238] sm:$0xff]  }
  0x30   :  { %2244 = vmatprep.subr.bf16.mxu0 %v2508_v6  ;;  %v2561_v6 = vld [vmem:[%s3303_s0 + $0x10] ss:$36 sps:$4 sm:$0xff]  }
  0x31   :  { %2265 = vmatpush3.bf16.msra.mxu1 %v2507_v5  ;;  %v2560_v5 = vld [vmem:[%s3304_s1 + $0x2f8] sm:$0xff]  }
  0x32   :  { %2266 = vmatprep.subr.bf16.mxu1 %v2510_v7  ;;  %v2563_v7 = vld [vmem:[%s3303_s0 + $0x58] ss:$36 sps:$4 sm:$0xff]  }
  0x33   :  { %2245 = vmatpush3.bf16.msra.mxu0 %v2509_v8  ;;  %v2565_v8 = vld [vmem:[%s3304_s1 + $0x2b8] sm:$0xff]  }
  0x34   :  { %2246 = vmatprep.subr.bf16.mxu0 %v2512_v10  ;;  %v164_v10 = vrot.slane %v2563_v7, %v2821_v42 }
  0x35   :  { %2267 = vmatpush3.bf16.msra.mxu1 %v2511_v9  ;;  %v150_v9 = vrot.slane %v2561_v6, %v2821_v42  ;;  %v2607_v6 = vld [vmem:[%s3304_s1 + $0x400] sm:$0xff]  }
  0x36   :  { %2268 = vmatprep.subr.bf16.mxu1 %v2514_v11  ;;  %v2566_v11 = vld [vmem:[%s3304_s1 + $0x340] sm:$0xff]  }
  0x37   :  { %2247 = vmatpush3.bf16.msra.mxu0 %v2513_v12  ;;  %v2567_v12 = vld [vmem:[%s3303_s0 + $0x14] ss:$36 sps:$4 sm:$0xff]  }
  0x38   :  { %2248 = vmatprep.subr.bf16.mxu0 %v2516_v14  ;;  %v173_v14 = vcombine.high %v150_v9, %v164_v10 }
  0x39   :  { %2269 = vmatpush3.bf16.msra.mxu1 %v2515_v13  ;;  %v2568_v13 = vld [vmem:[%s3303_s0 + $0x5c] ss:$36 sps:$4 sm:$0xff]  }
  0x3a   :  { %2270 = vmatprep.subr.bf16.mxu1 %v2518_v15  ;;  %v172_v15 = vcombine.low %v150_v9, %v164_v10 }
  0x3b   :  { %2249 = vmatpush3.bf16.msra.mxu0 %v2517_v16  ;;  %v157_v16 = vrot.slane %v2567_v12, %v2821_v42  ;;  %v2610_v12 = vld [vmem:[%s3304_s1 + $0x450] sm:$0xff]  }
  0x3c   :  { %2250 = vmatprep.subr.bf16.mxu0 %v2520_v18  ;;  %v2570_v18 = vld [vmem:[%s3304_s1 + $0x3c0] sm:$0xff]   ;;  %v256_v20 = vpack.c.bf16 %v172_v15, %v172_v15  ;;  %v2613_v15 = vld [vmem:[%s3304_s1 + $0x418] sm:$0xff]  }
  0x3d   :  { %2271 = vmatpush3.bf16.msra.mxu1 %v2519_v17  ;;  %v171_v17 = vrot.slane %v2568_v13, %v2821_v42  ;;  %v2611_v13 = vld [vmem:[%s3304_s1 + $0x410] sm:$0xff]  }
  0x3e   :  { %2272 = vmatprep.subr.bf16.mxu1 %v2522_v19  ;;  %v257_v19 = vpack.c.bf16 %v173_v14, %v173_v14  ;;  %v2612_v14 = vld [vmem:[%s3304_s1 + $0x458] sm:$0xff]  }
  0x3f   :  { %2251 = vmatpush3.bf16.msra.mxu0 %v2521_v22  ;;  %v175_v22 = vcombine.high %v157_v16, %v171_v17  ;;  %v174_v23 = vcombine.low %v157_v16, %v171_v17  ;;  %v2614_v16 = vld [vmem:[%s3304_s1 + $0x460] sm:$0xff]  }
  0x40   :  { %2280 = vmatprep.subr.bf16.mxu0 %v2528_v30  ;;  %v2576_v30 = vld [vmem:[%s3304_s1 + $0x350] sm:$0xff]   ;;  %v2622_v17 = vld [vmem:[%s3303_s0 + $0x20] ss:$36 sps:$4 sm:$0xff]  }
  0x41   :  { %2273 = vmatpush3.bf16.msra.mxu1 %v2527_v25  ;;  %v2571_v25 = vld [vmem:[%s3304_s1 + $0x380] sm:$0xff]   ;;  %v259_v26 = vpack.c.bf16 %v175_v22, %v175_v22  ;;  %v258_v27 = vpack.c.bf16 %v174_v23, %v174_v23 }
  0x42   :  { %2302 = vmatprep.subr.bf16.mxu1 %v2532_v33  ;;  %1538 = vmatmul.mubr.bf16.vlgmr.msra.gmra.mrb[4].mxu0 %v252_v35  ;;  %v2578_v33 = vld [vmem:[%s3304_s1 + $0x3d0] sm:$0xff]  }
  0x43   :  { %2281 = vmatpush3.bf16.msra.mxu0 %v2531_v36  ;;  %1617 = vmatprep.mubr.bf16.mxu0 %v257_v19  ;;  %v2579_v35 = vld [vmem:[%s3304_s1 + $0x390] sm:$0xff]   ;;  %v2581_v36 = vld [vmem:[%s3304_s1 + $0x318] sm:$0xff]   ;;  %v2615_v19 = vld [vmem:[%s3304_s1 + $0x420] sm:$0xff]  }
  0x44   :  { %1578 = vmatmul.mubr.bf16.vlgmr.msra.gmra.mrb[4].mxu1 %v254_v43  ;;  %2282 = vmatprep.subr.bf16.mxu0 %v2534_v40  ;;  %v2585_v40 = vld [vmem:[%s3304_s1 + $0x320] sm:$0xff]   ;;  %v2588_v43 = vld [vmem:[%s3304_s1 + $0x368] sm:$0xff]  }
  0x45   :  { %2303 = vmatpush3.bf16.msra.mxu1 %v2533_v39  ;;  %1657 = vmatprep.mubr.bf16.mxu1 %v259_v26  ;;  %v2583_v39 = vld [vmem:[%s3304_s1 + $0x398] sm:$0xff]  }
  0x46   :  { %2304 = vmatprep.subr.bf16.mxu1 %v2536_v45  ;;  %v2589_v45 = vld [vmem:[%s3304_s1 + $0x328] sm:$0xff]  }
  0x47   :  { %2283 = vmatpush3.bf16.msra.mxu0 %v2535_v44  ;;  %v2587_v44 = vld [vmem:[%s3304_s1 + $0x3a0] sm:$0xff]  }
  0x48   :  { %2284 = vmatprep.subr.bf16.mxu0 %v2538_v47  ;;  %v2592_v47 = vld [vmem:[%s3304_s1 + $0x370] sm:$0xff]  }
  0x49   :  { %2305 = vmatpush3.bf16.msra.mxu1 %v2537_v46  ;;  %v2590_v46 = vld [vmem:[%s3304_s1 + $0x3e8] sm:$0xff]  }
  0x4a   :  { %2306 = vmatprep.subr.bf16.mxu1 %v2540_v49  ;;  %v2593_v49 = vld [vmem:[%s3304_s1 + $0x330] sm:$0xff]  }
  0x4b   :  { %2285 = vmatpush3.bf16.msra.mxu0 %v2539_v48  ;;  %v2591_v48 = vld [vmem:[%s3304_s1 + $0x3a8] sm:$0xff]  }
  0x4c   :  { %2286 = vmatprep.subr.bf16.mxu0 %v2542_v51  ;;  %v2595_v51 = vld [vmem:[%s3304_s1 + $0x3b0] sm:$0xff]  }
  0x4d   :  { %2307 = vmatpush3.bf16.msra.mxu1 %v2541_v50  ;;  %v2594_v50 = vld [vmem:[%s3304_s1 + $0x3f0] sm:$0xff]  }
  0x4e   :  { %2308 = vmatprep.subr.bf16.mxu1 %v2544_v53  ;;  %v2597_v53 = vld [vmem:[%s3304_s1 + $0x338] sm:$0xff]  }
  0x4f   :  { %2287 = vmatpush3.bf16.msra.mxu0 %v2543_v52  ;;  %v2596_v52 = vld [vmem:[%s3304_s1 + $0x378] sm:$0xff]  }
  0x50   :  { %2288 = vmatprep.subr.bf16.mxu0 %v2546_v55  ;;  %v2599_v55 = vld [vmem:[%s3303_s0 + $0x18] ss:$36 sps:$4 sm:$0xff]  }
  0x51   :  { %2309 = vmatpush3.bf16.msra.mxu1 %v2545_v54  ;;  %v2598_v54 = vld [vmem:[%s3304_s1 + $0x3f8] sm:$0xff]  }
  0x52   :  { %2310 = vmatprep.subr.bf16.mxu1 %v2548_v57  ;;  %v186_v57 = vrot.slane %v2599_v55, %v2821_v42  ;;  %v2633_v55 = vld [vmem:[%s3308_s5 + $0x8] sm:$0xff]  }
  0x53   :  { %2289 = vmatpush3.bf16.msra.mxu0 %v2547_v56  ;;  %v2601_v56 = vld [vmem:[%s3303_s0 + $0x60] ss:$36 sps:$4 sm:$0xff]  }
  0x54   :  { %2290 = vmatprep.subr.bf16.mxu0 %v2550_v59  ;;  %v200_v59 = vrot.slane %v2601_v56, %v2821_v42  ;;  %v2634_v56 = vld [vmem:[%s3308_s5 + $0x10] sm:$0xff]  }
  0x55   :  { %2311 = vmatpush3.bf16.msra.mxu1 %v2549_v58  ;;  %v2603_v58 = vld [vmem:[%s3304_s1 + $0x3b8] sm:$0xff]  }
  0x56   :  { %2312 = vmatprep.subr.bf16.mxu1 %v2552_v61  ;;  %v2605_v61 = vld [vmem:[%s3303_s0 + $0x1c] ss:$36 sps:$4 sm:$0xff]  }
  0x57   :  { %2291 = vmatpush3.bf16.msra.mxu0 %v2551_v60  ;;  %v2604_v60 = vld [vmem:[%s3304_s1 + $0x440] sm:$0xff]  }
  0x58   :  { %2292 = vmatprep.subr.bf16.mxu0 %v2554_v63  ;;  %v209_v63 = vcombine.high %v186_v57, %v200_v59 }
  0x59   :  { %2313 = vmatpush3.bf16.msra.mxu1 %v2553_v62  ;;  %v2606_v62 = vld [vmem:[%s3303_s0 + $0x64] ss:$36 sps:$4 sm:$0xff]  }
  0x5a   :  { %2314 = vmatprep.subr.bf16.mxu1 %v2556_v1  ;;  %v193_v1 = vrot.slane %v2605_v61, %v2821_v42  ;;  %v2637_v61 = vld [vmem:[%s3308_s5 + $0x28] sm:$0xff]  }
  0x5b   :  { %2293 = vmatpush3.bf16.msra.mxu0 %v2555_v0  ;;  %v208_v0 = vcombine.low %v186_v57, %v200_v59  ;;  %v2635_v57 = vld [vmem:[%s3308_s5 + $0x18] sm:$0xff]  }
  0x5c   :  { %2294 = vmatprep.subr.bf16.mxu0 %v2558_v3  ;;  %v261_v3 = vpack.c.bf16 %v209_v63, %v209_v63 }
  0x5d   :  { %2315 = vmatpush3.bf16.msra.mxu1 %v2557_v2  ;;  %v207_v2 = vrot.slane %v2606_v62, %v2821_v42 }
  0x5e   :  { %2316 = vmatprep.subr.bf16.mxu1 %v2560_v5 }
  0x5f   :  { %2295 = vmatpush3.bf16.msra.mxu0 %v2559_v4  ;;  %v260_v4 = vpack.c.bf16 %v208_v0, %v208_v0  ;;  %v211_v5 = vcombine.high %v193_v1, %v207_v2  ;;  %v210_v7 = vcombine.low %v193_v1, %v207_v2 }
  0x60   :  { %2324 = vmatprep.subr.bf16.mxu0 %v2566_v11  ;;  %v2609_v11 = vld [vmem:[%s3304_s1 + $0x408] sm:$0xff]  }
  0x61   :  { %2317 = vmatpush3.bf16.msra.mxu1 %v2565_v8  ;;  %v2608_v8 = vld [vmem:[%s3304_s1 + $0x448] sm:$0xff]   ;;  %v263_v9 = vpack.c.bf16 %v211_v5, %v211_v5  ;;  %v262_v10 = vpack.c.bf16 %v210_v7, %v210_v7 }
  0x62   :  { %2346 = vmatprep.subr.bf16.mxu1 %v2570_v18  ;;  %1618 = vmatmul.mubr.bf16.vlgmr.msra.gmra.mrb[8].mxu0 %v256_v20  ;;  %v2623_v18 = vld [vmem:[%s3303_s0 + $0x68] ss:$36 sps:$4 sm:$0xff]  }
  0x63   :  { %2325 = vmatpush3.bf16.msra.mxu0 %v2569_v21  ;;  %1697 = vmatprep.mubr.bf16.mxu0 %v261_v3  ;;  %v2616_v20 = vld [vmem:[%s3304_s1 + $0x468] sm:$0xff]   ;;  %v220_v21 = vrot.slane %v2622_v17, %v2821_v42  ;;  %v227_v22 = vrot.slane %v2623_v18, %v2821_v42  ;;  %v2620_v42 = vld [vmem:[%s3304_s1 + $0x478] sm:$0xff]  }
  0x64   :  { %2326 = vmatprep.subr.bf16.mxu0 %v2572_v24  ;;  %1658 = vmatmul.mubr.bf16.vlgmr.msra.gmra.mrb[8].mxu1 %v258_v27  ;;  %v2617_v24 = vld [vmem:[%s3304_s1 + $0x428] sm:$0xff]   ;;  %v2619_v27 = vld [vmem:[%s3304_s1 + $0x430] sm:$0xff]  }
  0x65   :  { %2347 = vmatpush3.bf16.msra.mxu1 %v2571_v25  ;;  %1737 = vmatprep.mubr.bf16.mxu1 %v263_v9  ;;  %v229_v23 = vcombine.high %v220_v21, %v227_v22  ;;  %v2618_v25 = vld [vmem:[%s3304_s1 + $0x470] sm:$0xff]  }
  0x66   :  { %2348 = vmatprep.subr.bf16.mxu1 %v2574_v29  ;;  %v2621_v29 = vld [vmem:[%s3304_s1 + $0x438] sm:$0xff]  }
  0x67   :  { %2327 = vmatpush3.bf16.msra.mxu0 %v2573_v28  ;;  %v265_v26 = vpack.c.bf16 %v229_v23, %v229_v23  ;;  %v228_v28 = vcombine.low %v220_v21, %v227_v22 }
  0x68   :  { %2328 = vmatprep.subr.bf16.mxu0 %v2576_v30 }
  0x69   :  { %2349 = vmatpush3.bf16.msra.mxu1 %v2575_v31  ;;  %v264_v30 = vpack.c.bf16 %v228_v28, %v228_v28  ;;  %v2624_v31 = vld [vmem:[%s3306_s3] sm:$0xff]  }
  0x6a   :  { %2350 = vmatprep.subr.bf16.mxu1 %v2578_v33  ;;  %v2625_v33 = vld [vmem:[%s3306_s3 + $0x8] sm:$0xff]  }
  0x6b   :  { %2329 = vmatpush3.bf16.msra.mxu0 %v2577_v32  ;;  %v2665_v32 = vmov 0.0  }
  0x6c   :  { %2330 = vmatprep.subr.bf16.mxu0 %v2580_v34  ;;  %v2626_v34 = vld [vmem:[%s3306_s3 + $0x10] sm:$0xff]  }
  0x6d   :  { %2351 = vmatpush3.bf16.msra.mxu1 %v2579_v35  ;;  %v2627_v35 = vld [vmem:[%s3306_s3 + $0x18] sm:$0xff]  }
  0x6e   :  { %2352 = vmatprep.subr.bf16.mxu1 %v2582_v37  ;;  %v2629_v37 = vld [vmem:[%s3306_s3 + $0x28] sm:$0xff]  }
  0x6f   :  { %2331 = vmatpush3.bf16.msra.mxu0 %v2581_v36  ;;  %v2628_v36 = vld [vmem:[%s3306_s3 + $0x20] sm:$0xff]  }
  0x70   :  { %2332 = vmatprep.subr.bf16.mxu0 %v2584_v38 }
  0x71   :  { %2353 = vmatpush3.bf16.msra.mxu1 %v2583_v39 }
  0x72   :  { %2354 = vmatprep.subr.bf16.mxu1 %v2586_v41 }
  0x73   :  { %2333 = vmatpush3.bf16.msra.mxu0 %v2585_v40  ;;  %v2029_v40 = vld [vmem:[%s3305_s2] ss:$0 sm:$0xff] }
  0x74   :  { %2334 = vmatprep.subr.bf16.mxu0 %v2588_v43 }
  0x75   :  { %2355 = vmatpush3.bf16.msra.mxu1 %v2587_v44 }
  0x76   :  { %2356 = vmatprep.subr.bf16.mxu1 %v2590_v46 }
  0x77   :  { %2335 = vmatpush3.bf16.msra.mxu0 %v2589_v45 }
  0x78   :  { %2336 = vmatprep.subr.bf16.mxu0 %v2592_v47 }
  0x79   :  { %2357 = vmatpush3.bf16.msra.mxu1 %v2591_v48 }
  0x7a   :  { %2358 = vmatprep.subr.bf16.mxu1 %v2594_v50 }
  0x7b   :  { %2337 = vmatpush3.bf16.msra.mxu0 %v2593_v49 }
  0x7c   :  { %2338 = vmatprep.subr.bf16.mxu0 %v2596_v52  ;;  %v2630_v52 = vld [vmem:[%s3306_s3 + $0x30] sm:$0xff]  }
  0x7d   :  { %2359 = vmatpush3.bf16.msra.mxu1 %v2595_v51 }
  0x7e   :  { %2360 = vmatprep.subr.bf16.mxu1 %v2598_v54  ;;  %v2632_v54 = vld [vmem:[%s3308_s5] sm:$0xff]  }
  0x7f   :  { %2339 = vmatpush3.bf16.msra.mxu0 %v2597_v53  ;;  %v2631_v53 = vld [vmem:[%s3306_s3 + $0x38] sm:$0xff]  }
  0x80   :  { %2368 = vmatprep.subr.bf16.mxu0 %v2604_v60 }
  0x81   :  { %2361 = vmatpush3.bf16.msra.mxu1 %v2603_v58  ;;  %v2636_v58 = vld [vmem:[%s3308_s5 + $0x20] sm:$0xff]  }
  0x82   :  { %1698 = vmatmul.mubr.bf16.vlgmr.msra.gmra.mrb[12].mxu0 %v260_v4  ;;  %2408 = vmatprep.subr.bf16.mxu1 %v2665_v32 }
  0x83   :  { %2369 = vmatpush3.bf16.msra.mxu0 %v2607_v6  ;;  %1777 = vmatprep.mubr.bf16.mxu0 %v265_v26 }
  0x84   :  { %1738 = vmatmul.mubr.bf16.vlgmr.msra.gmra.mrb[12].mxu1 %v262_v10  ;;  %2370 = vmatprep.subr.bf16.mxu0 %v2608_v8 }
  0x85   :  { %2409 = vmatpush3.bf16.msra.mxu1 %v2624_v31  ;;  %2424 = vmatprep.mubr.msk.bf16.mxu1 %vm2666_vm0, %v2665_v32 }
  0x86   :  { %2410 = vmatprep.subr.bf16.mxu1 %v2665_v32 }
  0x87   :  { %2371 = vmatpush3.bf16.msra.mxu0 %v2609_v11 }
  0x88   :  { %2372 = vmatprep.subr.bf16.mxu0 %v2610_v12 }
  0x89   :  { %2411 = vmatpush3.bf16.msra.mxu1 %v2625_v33 }
  0x8a   :  { %2412 = vmatprep.subr.bf16.mxu1 %v2665_v32 }
  0x8b   :  { %2373 = vmatpush3.bf16.msra.mxu0 %v2611_v13 }
  0x8c   :  { %2374 = vmatprep.subr.bf16.mxu0 %v2612_v14 }
  0x8d   :  { %2413 = vmatpush3.bf16.msra.mxu1 %v2626_v34 }
  0x8e   :  { %2414 = vmatprep.subr.bf16.mxu1 %v2665_v32 }
  0x8f   :  { %2375 = vmatpush3.bf16.msra.mxu0 %v2613_v15 }
  0x90   :  { %2376 = vmatprep.subr.bf16.mxu0 %v2614_v16 }
  0x91   :  { %2415 = vmatpush3.bf16.msra.mxu1 %v2627_v35 }
  0x92   :  { %2416 = vmatprep.subr.bf16.mxu1 %v2665_v32 }
  0x93   :  { %2377 = vmatpush3.bf16.msra.mxu0 %v2615_v19 }
  0x94   :  { %2378 = vmatprep.subr.bf16.mxu0 %v2616_v20 }
  0x95   :  { %2417 = vmatpush3.bf16.msra.mxu1 %v2628_v36 }
  0x96   :  { %2418 = vmatprep.subr.bf16.mxu1 %v2665_v32 }
  0x97   :  { %2379 = vmatpush3.bf16.msra.mxu0 %v2617_v24 }
  0x98   :  { %2380 = vmatprep.subr.bf16.mxu0 %v2618_v25 }
  0x99   :  { %2419 = vmatpush3.bf16.msra.mxu1 %v2629_v37 }
  0x9a   :  { %2420 = vmatprep.subr.bf16.mxu1 %v2665_v32 }
  0x9b   :  { %2381 = vmatpush3.bf16.msra.mxu0 %v2619_v27 }
  0x9c   :  { %2382 = vmatprep.subr.bf16.mxu0 %v2620_v42 }
  0x9d   :  { %2421 = vmatpush3.bf16.msra.mxu1 %v2630_v52 }
  0x9e   :  { %2422 = vmatprep.subr.bf16.mxu1 %v2665_v32 }
  0x9f   :  { %2383 = vmatpush3.bf16.msra.mxu0 %v2621_v29 }
  0xa0   :  { %2428 = vmatprep.subr.bf16.mxu0 %v2665_v32 }
  0xa1   :  { %2423 = vmatpush3.bf16.msra.mxu1 %v2631_v53 }
  0xa2   :  { %1778 = vmatmul.mubr.bf16.vlgmr.msra.gmra.mrb[16].mxu0 %v264_v30 }
  0xa3   :  { %2444 = vmatprep.mubr.msk.bf16.mxu0 %vm2666_vm0, %v2665_v32  ;;  %2429 = vmatpush3.bf16.msra.mxu0 %v2632_v54 }
  0xa4   :  { %2430 = vmatprep.subr.bf16.mxu0 %v2665_v32 }
  0xa7   :  { %2431 = vmatpush3.bf16.msra.mxu0 %v2633_v55 }
  0xa8   :  { %2432 = vmatprep.subr.bf16.mxu0 %v2665_v32 }
  0xab   :  { %2433 = vmatpush3.bf16.msra.mxu0 %v2634_v56 }
  0xac   :  { %2434 = vmatprep.subr.bf16.mxu0 %v2665_v32 }
  0xaf   :  { %2435 = vmatpush3.bf16.msra.mxu0 %v2635_v57 }
  0xb0   :  { %2436 = vmatprep.subr.bf16.mxu0 %v2665_v32 }
  0xb3   :  { %2437 = vmatpush3.bf16.msra.mxu0 %v2636_v58 }
  0xb4   :  { %2438 = vmatprep.subr.bf16.mxu0 %v2665_v32 }
  0xb7   :  { %2439 = vmatpush3.bf16.msra.mxu0 %v2637_v61 }
  0xb8   :  { %2440 = vmatprep.subr.bf16.mxu0 %v2665_v32 }
  0xf5   :  { %v2208_v38 = vpop.f32.mrb[0].mxu0 }
  0xf6   :  { %v2209_v41 = vpop.f32.mrb[1].mxu0 }
  0xf7   :  { %v2230_v39 = vpop.f32.mrb[0].mxu1  ;;  %v2210_v44 = vadd.f32 %v2209_v41, %v2208_v38  ;;  %v2211_v45 = vpop.f32.mrb[2].mxu0  ;;  %v2639_v41 = vld [vmem:[%s3308_s5 + $0x38] sm:$0xff]  }
  0xf8   :  { %v2231_v43 = vpop.f32.mrb[1].mxu1  ;;  %v2212_v48 = vpop.f32.mrb[3].mxu0 }
  0xf9   :  { %v2232_v46 = vadd.f32 %v2231_v43, %v2230_v39  ;;  %v2233_v47 = vpop.f32.mrb[2].mxu1  ;;  %v1460_v50 = vadd.f32 %v2210_v44, %v2029_v40  ;;  %v2638_v40 = vld [vmem:[%s3308_s5 + $0x30] sm:$0xff]   ;;  %v2174_v43 = vld [vmem:[%s3307_s4] ss:$0 sm:$0xff] }
  0xfa   :  { %v2234_v49 = vpop.f32.mrb[3].mxu1  ;;  %2441 = vmatpush3.bf16.msra.mxu0 %v2638_v40 }
  0xfb   :  { %v1500_v51 = vadd.f32 %v2232_v46, %v1460_v50  ;;  %2442 = vmatprep.subr.bf16.mxu0 %v2665_v32  ;;  %v2183_v32 = vld [vmem:[%s3309_s6] ss:$0 sm:$0xff] }
  0xfe   :  { %2443 = vmatpush3.bf16.msra.mxu0 %v2639_v41 }
 0x115   :  { %v2252_v59 = vpop.f32.mrb[4].mxu0 }
 0x116   :  { %v2253_v60 = vpop.f32.mrb[5].mxu0 }
 0x117   :  { %v2254_v62 = vadd.f32 %v2253_v60, %v2252_v59  ;;  %v2255_v63 = vpop.f32.mrb[6].mxu0  ;;  %v2274_v0 = vpop.f32.mrb[4].mxu1 }
 0x118   :  { %v2256_v1 = vpop.f32.mrb[7].mxu0  ;;  %v2275_v2 = vpop.f32.mrb[5].mxu1 }
 0x119   :  { %v1540_v3 = vadd.f32 %v2254_v62, %v1500_v51  ;;  %v2276_v4 = vadd.f32 %v2275_v2, %v2274_v0  ;;  %v2277_v5 = vpop.f32.mrb[6].mxu1 }
 0x11a   :  { %v2278_v6 = vpop.f32.mrb[7].mxu1 }
 0x11b   :  { %v1580_v7 = vadd.f32 %v2276_v4, %v1540_v3 }
 0x135   :  { %v2296_v8 = vpop.f32.mrb[8].mxu0 }
 0x136   :  { %v2297_v9 = vpop.f32.mrb[9].mxu0 }
 0x137   :  { %v2298_v10 = vadd.f32 %v2297_v9, %v2296_v8  ;;  %v2299_v11 = vpop.f32.mrb[10].mxu0  ;;  %v2318_v12 = vpop.f32.mrb[8].mxu1 }
 0x138   :  { %v2300_v13 = vpop.f32.mrb[11].mxu0  ;;  %v2319_v15 = vpop.f32.mrb[9].mxu1 }
 0x139   :  { %v1620_v14 = vadd.f32 %v2298_v10, %v1580_v7  ;;  %v2320_v16 = vadd.f32 %v2319_v15, %v2318_v12  ;;  %v2321_v17 = vpop.f32.mrb[10].mxu1 }
 0x13a   :  { %v2322_v18 = vpop.f32.mrb[11].mxu1 }
 0x13b   :  { %v1660_v19 = vadd.f32 %v2320_v16, %v1620_v14 }
 0x155   :  { %v2340_v20 = vpop.f32.mrb[12].mxu0 }
 0x156   :  { %v2341_v21 = vpop.f32.mrb[13].mxu0 }
 0x157   :  { %v2342_v22 = vadd.f32 %v2341_v21, %v2340_v20  ;;  %v2343_v23 = vpop.f32.mrb[14].mxu0  ;;  %v2362_v24 = vpop.f32.mrb[12].mxu1 }
 0x158   :  { %v2344_v25 = vpop.f32.mrb[15].mxu0  ;;  %v2363_v26 = vpop.f32.mrb[13].mxu1 }
 0x159   :  { %v1700_v27 = vadd.f32 %v2342_v22, %v1660_v19  ;;  %v2364_v42 = vadd.f32 %v2363_v26, %v2362_v24  ;;  %v2365_v28 = vpop.f32.mrb[14].mxu1 }
 0x15a   :  { %v2366_v29 = vpop.f32.mrb[15].mxu1 }
 0x15b   :  { %v1740_v30 = vadd.f32 %v2364_v42, %v1700_v27 }
 0x175   :  { %v2384_v31 = vpop.f32.mrb[16].mxu0 }
 0x176   :  { %v2385_v33 = vpop.f32.mrb[17].mxu0 }
 0x177   :  { %v2386_v34 = vadd.f32 %v2385_v33, %v2384_v31  ;;  %v2387_v35 = vpop.f32.mrb[18].mxu0 }
 0x178   :  { %v2388_v36 = vpop.f32.mrb[19].mxu0 }
 0x179   :  { %v1780_v37 = vadd.f32 %v2386_v34, %v1740_v30 }
 0x17b   :  { %v1785_v38 = vmax.f32 %v1780_v37, 0.0 }
 0x17d   :  { %v1786_v39 = vpack.c.bf16 %v1785_v38, %v1785_v38 }
 0x17f   :  { %2425 = vmatmul.mubr.bf16.vlgmr.msra.gmra.mrb[16].mxu1 %v1786_v39 }
 0x252   :  { %v1892_v44 = vpop.f32.mrb[16].mxu1 }
 0x253   :  { %v1893_v45 = vadd.f32 %v2174_v43, %v1892_v44  ;;  %v2426_v46 = vpop.f32.mrb[17].mxu1 }
 0x254   :  { %v1895_v47 = vpop.f32.mrb[18].mxu1 }
 0x255   :  { %v1898_v48 = vmax.f32 %v1893_v45, 0.0  ;;  %v2427_v49 = vpop.f32.mrb[19].mxu1 }
 0x257   :  { %v1899_v50 = vpack.c.bf16 %v1898_v48, %v1898_v48 }
 0x259   :  { %2445 = vmatmul.mubr.bf16.vlgmr.msra.gmra.mrb[20].mxu0 %v1899_v50 }
 0x32c   :  { %v2005_v51 = vpop.f32.mrb[20].mxu0 }
 0x32d   :  { %v2006_v52 = vadd.f32 %v2183_v32, %v2005_v51  ;;  %v2446_v53 = vpop.f32.mrb[21].mxu0 }
 0x32e   :  { %v2008_v54 = vpop.f32.mrb[22].mxu0 }
 0x32f   :  { %2012 = vst.msk [vmem:[#allocation2] sm:$0xff] %vm2011_vm1, %v2006_v52  ;;  %v2447_v55 = vpop.f32.mrb[23].mxu0 }
 0x330   :  { %2017 = vsyncadd [#allocation3], 96  ;;  %s2667_s4 = smov [#allocation2]  }
 0x331   :  { %s2018_s5 = sshll.u32 %s2667_s4, 4  ;;  %s2019_s5 = int_to_ptr.vmem [resolvable:$true] %s2018_s5 }
 0x332   :  { %s2640_s12 = scalar_lea.vmem %s2019_s5, 32  ;;  %s2644_s13 = scalar_lea.vmem %s2019_s5, 128 }
 0x333   :  { %p2641_p0 = scmp.ne.s32.totalorder %s2019_s5, %s2640_s12  ;;  %p2645_p1 = scmp.lt.s32.totalorder %s2019_s5, %s2019_s5 }
 0x334   :  { %p2646_p2 = scmp.lt.s32.totalorder %s2644_s13, %s2640_s12 }
 0x336   :  { %p2647_p3 = por %p2646_p2, %p2645_p1 }
 0x338   :  { %p2648_p4 = pnand %p2647_p3, %p2641_p0 }
 0x33a   :  { %2651 = shalt.err (!%p2648_p4)
}
 0x33b   :  { %s2652_s15 = scalar_lea.hbm %s3310_s7, 32 }
 0x33c   :  { %p2653_p5 = scmp.ne.s32.totalorder %s3310_s7, %s2652_s15  ;;  %p2656_p6 = scmp.lt.u32.totalorder %s2652_s15, %s3310_s7 }
 0x33e   :  { %p2658_p7 = pnand %p2656_p6, %p2653_p5 }
 0x340   :  { %2661 = shalt.err (!%p2658_p7)
}
 0x341   :  { %s2668_s18 = smov 32   ;;  %s2669_s19 = smov 2  }
 0x342   :  { %2024 = dma.vmem_to_hbm [thread:$0]  %s2019_s5, 32, %s3310_s7, [#allocation3], %s2668_s18, %s2668_s18, %s2669_s19  }
 0x343   :  { %2662 = dma.done.wait [#allocation3], 128  }
 0x344   :  { %2663 = vsyncadd [#allocation3], 4294967168 }
 0x345   :  { %2028 = vsyncpa [#allocation3], 1 }

</bundles_post_ra>
